<compile_context>
chip_gen: v7x
topology: tpu7x:2x2x1
jax: 0.10.0
libtpu: 0.0.40
codegen_flags: <defaults>
</compile_context>

<pallas_src>
import functools

import jax
import jax.numpy as jnp
from jax.experimental import pallas as pl
from jax.experimental.pallas import tpu as pltpu


def _axpb_kernel(x_ref, o_ref, *, a, b):
    # out = a * x + b  (elementwise, VPU).  a/b are Python-float closure
    # constants (weakly typed -> compute stays in x's dtype); explicit astype
    # keeps the store well-defined for packed dtypes.
    o_ref[...] = (a * x_ref[...] + b).astype(o_ref.dtype)


def module_forward(x: jax.Array, a: float = 3.0, b: float = 2.0) -> jax.Array:
    """Pallas equivalent of Module.forward: out = 3*x + 2 (buffer-valued)."""
    orig_shape = x.shape
    dtype = x.dtype
    n = x.size
    itemsize = jnp.dtype(dtype).itemsize

    # --- Lane-dense 2-D presentation -------------------------------------
    LANE = 128
    MAX_COLS = 16384  # keep the slab width reasonable (large multiple of 128)
    if n % LANE == 0:
        cols = LANE
        while cols * 2 <= MAX_COLS and n % (cols * 2) == 0:
            cols *= 2
        x2 = x.reshape(-1, cols)
    else:
        # Tiny / ragged case (covers the literal (2,2)): keep the trailing
        # dim; a block equal to the full array dims is always legal.
        x2 = x.reshape(-1, orig_shape[-1]) if x.ndim >= 2 else x.reshape(1, -1)
    rows, cols = x2.shape

    # --- Byte-budgeted row tiling (cdiv, partial last block masked) ------
    BLOCK_BUDGET_BYTES = 2 * 1024 * 1024  # ~2 MiB/block -> ~8 MiB pipelined
    rows_budget = max(1, BLOCK_BUDGET_BYTES // (cols * itemsize))
    block_rows = min(rows, rows_budget)
    if block_rows >= 8:
        block_rows = (block_rows // 8) * 8  # sublane-aligned tile
    grid = (pl.cdiv(rows, block_rows),)

    kernel = functools.partial(_axpb_kernel, a=a, b=b)
    out2 = pl.pallas_call(
        kernel,
        out_shape=jax.ShapeDtypeStruct((rows, cols), dtype),
        grid=grid,
        in_specs=[pl.BlockSpec((block_rows, cols), lambda i: (i, 0))],
        out_specs=pl.BlockSpec((block_rows, cols), lambda i: (i, 0)),
        compiler_params=pltpu.CompilerParams(
            dimension_semantics=("parallel",),
        ),
    )(x2)
    return out2.reshape(orig_shape)


if __name__ == "__main__":
    # Shape implied by the module's (2,2) buffers.
    key = jax.random.PRNGKey(0)
    x = jax.random.normal(key, (2, 2), dtype=jnp.float32)

    # Buffers exactly as in Module.__init__ (constant-filled).
    a_buf = 3.0 * jnp.ones((2, 2), dtype=jnp.float32)
    b_buf = 2.0 * jnp.ones((2, 2), dtype=jnp.float32)

    out = jax.block_until_ready(module_forward(x))
    ref = a_buf * x + b_buf
    assert jnp.allclose(out, ref, atol=1e-6), (out, ref)

    # Secondary check: exercise the lane-dense, tiled path (still small).
    x_big = jax.random.normal(jax.random.PRNGKey(1), (64, 384), dtype=jnp.float32)
    out_big = jax.block_until_ready(module_forward(x_big))
    ref_big = 3.0 * x_big + 2.0
    assert jnp.allclose(out_big, ref_big, atol=1e-6)

    print("KERNEL_OK")
</pallas_src>

<mosaic_0001>
module attributes {stable_mosaic.version = 11 : i64} {
  func.func @_axpb_kernel(%arg0: i32, %arg1: memref<2x2xf32, #tpu.memory_space<vmem>>, %arg2: memref<2x2xf32, #tpu.memory_space<vmem>>) attributes {dimension_semantics = [#tpu.dimension_semantics<parallel>], iteration_bounds = array<i64: 1>, scalar_prefetch = 0 : i64, scratch_operands = 0 : i64, tpu.core_type = #tpu.core_type<tc>, window_params = [{transform_indices = @transform_0, window_bounds = array<i64: 2, 2>}, {transform_indices = @transform_1, window_bounds = array<i64: 2, 2>}]} {
    %c0 = arith.constant 0 : index
    %c0_0 = arith.constant 0 : index
    %0 = vector.load %arg1[%c0, %c0_0] : memref<2x2xf32, #tpu.memory_space<vmem>>, vector<2x2xf32>
    %cst = arith.constant 3.000000e+00 : f32
    %1 = vector.broadcast %cst : f32 to vector<2x2xf32>
    %2 = arith.mulf %1, %0 : vector<2x2xf32>
    %cst_1 = arith.constant 2.000000e+00 : f32
    %3 = vector.broadcast %cst_1 : f32 to vector<2x2xf32>
    %4 = arith.addf %2, %3 : vector<2x2xf32>
    %c0_2 = arith.constant 0 : index
    %c0_3 = arith.constant 0 : index
    %5 = vector.load %arg2[%c0_2, %c0_3] : memref<2x2xf32, #tpu.memory_space<vmem>>, vector<2x2xf32>
    tpu.vector_store %arg2[%c0_2, %c0_3], %4 {strides = array<i32>} : memref<2x2xf32, #tpu.memory_space<vmem>>, vector<2x2xf32>,
    return
  }
  func.func @transform_0(%arg0: i32) -> (i32, i32) {
    %c0_i32 = arith.constant 0 : i32
    %c0_i32_0 = arith.constant 0 : i32
    return %arg0, %c0_i32 : i32, i32
  }
  func.func @transform_1(%arg0: i32) -> (i32, i32) {
    %c0_i32 = arith.constant 0 : i32
    %c0_i32_0 = arith.constant 0 : i32
    return %arg0, %c0_i32 : i32, i32
  }
}

</mosaic_0001>

<bundles_post_ra>
// kernel: tpu_custom_call.1
= control target key start
LH: loop header
LB: loop body
LE: loop exit
PB: predicated region body
PF: predicated region fallthrough
CT: control target
= control target key end

     0   :  { %6 = vsyncpa [#allocation3], 0  ;;  %s127_s0 = inlined_call_operand.hbm [shape: f32[2,2], index: 0, kind: input, shape index: {}]   ;;  %s128_s1 = inlined_call_operand.hbm [shape: f32[2,2], index: 1, kind: output, shape index: {}]  }
   0x1   :  { %7 = vsyncpa [#allocation4], 0  ;;  %s91_s6 = smov [#allocation2]   ;;  %s43_s10 = scalar_lea.hbm %s127_s0, 32 }
   0x2   :  { %s14_s7 = sshll.u32 %s91_s6, 4  ;;  %p44_p0 = scmp.ne.s32.totalorder %s127_s0, %s43_s10  ;;  %s15_s7 = int_to_ptr.vmem [resolvable:$true] %s14_s7 }
   0x3   :  { %p47_p1 = scmp.lt.u32.totalorder %s43_s10, %s127_s0 }
   0x5   :  { %p49_p2 = pnand %p47_p1, %p44_p0 }
   0x7   :  { %52 = shalt.err (!%p49_p2)
}
   0x8   :  { %s53_s15 = scalar_lea.vmem %s15_s7, 32  ;;  %p58_p4 = scmp.lt.s32.totalorder %s15_s7, %s15_s7 }
   0x9   :  { %p54_p3 = scmp.ne.s32.totalorder %s15_s7, %s53_s15  ;;  %p59_p5 = scmp.lt.s32.totalorder %s53_s15, %s53_s15 }
   0xb   :  { %p60_p6 = por %p59_p5, %p58_p4 }
   0xd   :  { %p61_p7 = pnand %p60_p6, %p54_p3 }
   0xf   :  { %64 = shalt.err (!%p61_p7)
}
  0x10   :  { %17 = dma.hbm_to_vmem [thread:$0]  %s127_s0, 32, %s15_s7, [#allocation3]  }
  0x11   :  { %87 = dma.done.wait [#allocation3], 32  }
  0x12   :  { %88 = vsyncadd [#allocation3], 4294967264  ;;  %v21_v0 = vld [vmem:[#allocation2] sm:$0x3]  ;;  %s92_s18 = smov [#allocation5]   ;;  %vm24_vm0 = vcmask 9216  }
  0x13   :  { %s32_s19 = sshll.u32 %s92_s18, 4  ;;  %v22_v1 = vmul.f32 3.0, %v21_v0  ;;  %s33_s19 = int_to_ptr.vmem [resolvable:$true] %s32_s19 }
  0x14   :  { %s65_s20 = scalar_lea.vmem %s33_s19, 32  ;;  %p70_p9 = scmp.lt.s32.totalorder %s33_s19, %s33_s19 }
  0x15   :  { %v23_v2 = vadd.f32 2.0, %v22_v1  ;;  %p66_p8 = scmp.ne.s32.totalorder %s33_s19, %s65_s20  ;;  %p71_p10 = scmp.lt.s32.totalorder %s65_s20, %s65_s20 }
  0x17   :  { %25 = vst.msk [vmem:[#allocation5] sm:$0x3] %vm24_vm0, %v23_v2  ;;  %p72_p11 = por %p71_p10, %p70_p9 }
  0x19   :  { %p73_p12 = pnand %p72_p11, %p66_p8 }
  0x1b   :  { %76 = shalt.err (!%p73_p12)
}
  0x1c   :  { %s77_s0 = scalar_lea.hbm %s128_s1, 32 }
  0x1d   :  { %p78_p13 = scmp.ne.s32.totalorder %s128_s1, %s77_s0  ;;  %p81_p0 = scmp.lt.u32.totalorder %s77_s0, %s128_s1 }
  0x1f   :  { %p83_p1 = pnand %p81_p0, %p78_p13 }
  0x21   :  { %86 = shalt.err (!%p83_p1)
}
  0x22   :  { %35 = dma.vmem_to_hbm [thread:$0]  %s33_s19, 32, %s128_s1, [#allocation4]  }
  0x23   :  { %89 = dma.done.wait [#allocation4], 32  }
  0x24   :  { %90 = vsyncadd [#allocation4], 4294967264 }
  0x25   :  { %39 = vsyncpa [#allocation3], 1 }
  0x26   :  { %40 = vsyncpa [#allocation4], 1 }

</bundles_post_ra>
